<compile_context>
chip_gen: v7x
topology: tpu7x:2x2x1
jax: 0.10.0
libtpu: 0.0.40
codegen_flags: <defaults>
</compile_context>

<pallas_src>
import jax
import jax.numpy as jnp
from jax.experimental import pallas as pl
from jax.experimental.pallas import tpu as pltpu

F_IN = 100           # real input / hidden feature width
FEAT = 128           # lane-padded hidden width
NUM_CLASSES = 10     # real output classes (kept narrow in the output)
F_PAD = FEAT - F_IN  # 28 padding lanes


def mlp_kernel(x_ref, w1_ref, b1_ref, w2_ref, b2_ref, w3_ref, b3_ref,
               w4_ref, b4_ref, o_ref, x128_ref):
    # Build a lane-aligned (TM,128) input tile in VMEM: copy the 100 real lanes and
    # zero the 28 pad lanes. Zeroing happens every grid step (trivially cheap, all
    # on-chip) so the kernel stays correct when the batch axis is sharded across
    # TensorCores ("parallel" semantics -> per-core scratch, no step-0 guarantee).
    tm = x_ref.shape[0]
    x128_ref[:, pl.ds(0, F_IN)] = x_ref[...]
    x128_ref[:, pl.ds(F_IN, F_PAD)] = jnp.zeros((tm, F_PAD), jnp.float32)

    # Zero padding in x / weight rows / weight cols contributes exactly 0 to every
    # dot product, so results on real lanes match the unpadded computation.
    h = jnp.dot(x128_ref[...], w1_ref[...], preferred_element_type=jnp.float32)
    h = jnp.maximum(h + b1_ref[...], 0.0)
    h = jnp.dot(h, w2_ref[...], preferred_element_type=jnp.float32)
    h = jnp.maximum(h + b2_ref[...], 0.0)
    h = jnp.dot(h, w3_ref[...], preferred_element_type=jnp.float32)
    h = jnp.maximum(h + b3_ref[...], 0.0)
    logits = jnp.dot(h, w4_ref[...], preferred_element_type=jnp.float32) + b4_ref[...]

    # log_softmax over the 10 real classes (logits is already narrow: (TM, 10)).
    m = jnp.max(logits, axis=-1, keepdims=True)
    shifted = logits - m
    lse = jnp.log(jnp.sum(jnp.exp(shifted), axis=-1, keepdims=True))
    o_ref[...] = (shifted - lse).astype(o_ref.dtype)


def _round_up(x, m):
    return (x + m - 1) // m * m


def pad_params(params):
    """Pad params once (call this outside the forward path / training loop).

    w1..w3 -> (128,128), w4 -> (128,10); b1..b3 -> (1,128), b4 -> (1,10).
    """
    def pad_w(w, out_dim):
        return jnp.zeros((FEAT, out_dim), jnp.float32).at[:w.shape[0], :w.shape[1]].set(w)

    def pad_b(b, out_dim):
        if b.shape[1] == out_dim:
            return b.astype(jnp.float32)
        return jnp.zeros((1, out_dim), jnp.float32).at[:, :b.shape[1]].set(b)

    return {
        "w1": pad_w(params["w1"], FEAT), "b1": pad_b(params["b1"], FEAT),
        "w2": pad_w(params["w2"], FEAT), "b2": pad_b(params["b2"], FEAT),
        "w3": pad_w(params["w3"], FEAT), "b3": pad_b(params["b3"], FEAT),
        "w4": pad_w(params["w4"], NUM_CLASSES), "b4": pad_b(params["b4"], NUM_CLASSES),
    }


def net_arch2_forward(x, padded_params, *, max_tm=1024):
    """x: (B, 100) float32; padded_params: output of pad_params()."""
    B, f_in = x.shape
    assert f_in == F_IN
    pp = padded_params

    # Only round the batch to the 8-sublane granule (not to TM); a partial last grid
    # block is handled by Pallas (clamped loads, masked stores) and rows never mix.
    B8 = _round_up(B, 8)
    xin = x if B8 == B else jnp.zeros((B8, F_IN), x.dtype).at[:B].set(x)

    # Batch tile: big (amortize ~0.35us/step), but split into >=2 steps when the
    # batch is large enough so v7x's 2 TensorCores both get work.
    if B8 <= max_tm:
        TM = _round_up(pl.cdiv(B8, 2), 8) if B8 >= 256 else B8
    else:
        TM = max_tm
    grid = (pl.cdiv(B8, TM),)

    x_spec = pl.BlockSpec((TM, F_IN), lambda i: (i, 0))           # 100 == full last dim
    wh_spec = pl.BlockSpec((FEAT, FEAT), lambda i: (0, 0))        # constant -> VMEM-resident
    bh_spec = pl.BlockSpec((1, FEAT), lambda i: (0, 0))
    wo_spec = pl.BlockSpec((FEAT, NUM_CLASSES), lambda i: (0, 0))
    bo_spec = pl.BlockSpec((1, NUM_CLASSES), lambda i: (0, 0))
    out_spec = pl.BlockSpec((TM, NUM_CLASSES), lambda i: (i, 0))  # narrow 10-wide output

    weight_bytes = 4 * (3 * FEAT * FEAT + FEAT * NUM_CLASSES + 3 * FEAT + NUM_CLASSES)
    cost = pl.CostEstimate(
        flops=2 * B8 * (3 * FEAT * FEAT + FEAT * NUM_CLASSES),
        transcendentals=B8 * (NUM_CLASSES + 1),
        bytes_accessed=4 * B8 * (F_IN + NUM_CLASSES) + weight_bytes,
    )

    out = pl.pallas_call(
        mlp_kernel,
        out_shape=jax.ShapeDtypeStruct((B8, NUM_CLASSES), jnp.float32),
        grid=grid,
        in_specs=[x_spec,
                  wh_spec, bh_spec,
                  wh_spec, bh_spec,
                  wh_spec, bh_spec,
                  wo_spec, bo_spec],
        out_specs=out_spec,
        scratch_shapes=[pltpu.VMEM((TM, FEAT), jnp.float32)],
        compiler_params=pltpu.CompilerParams(
            dimension_semantics=("parallel",)),   # batch axis shardable over v7x's 2 TCs
        cost_estimate=cost,
    )(xin, pp["w1"], pp["b1"], pp["w2"], pp["b2"],
      pp["w3"], pp["b3"], pp["w4"], pp["b4"])

    return out if B8 == B else out[:B]


def init_params(key):
    """PyTorch-Linear-style init U(-1/sqrt(fan_in), 1/sqrt(fan_in)); weights stored as (in, out)."""
    dims = [(100, 100), (100, 100), (100, 100), (100, 10)]
    params = {}
    keys = jax.random.split(key, 2 * len(dims))
    for i, (fan_in, fan_out) in enumerate(dims):
        bound = 1.0 / jnp.sqrt(float(fan_in))
        w = jax.random.uniform(keys[2 * i], (fan_in, fan_out),
                               minval=-bound, maxval=bound, dtype=jnp.float32)
        b = jax.random.uniform(keys[2 * i + 1], (1, fan_out),
                               minval=-bound, maxval=bound, dtype=jnp.float32)
        params[f"w{i + 1}"] = w
        params[f"b{i + 1}"] = b
    return params


def reference_forward(x, p):
    h = jnp.maximum(x @ p["w1"] + p["b1"], 0.0)
    h = jnp.maximum(h @ p["w2"] + p["b2"], 0.0)
    h = jnp.maximum(h @ p["w3"] + p["b3"], 0.0)
    logits = h @ p["w4"] + p["b4"]
    return jax.nn.log_softmax(logits, axis=1)


if __name__ == "__main__":
    key = jax.random.PRNGKey(0)
    k_params, k_x1, k_x2 = jax.random.split(key, 3)
    params = init_params(k_params)
    padded = pad_params(params)   # pad once, outside the forward path

    # Batch 8 (exactly sublane-aligned).
    x = jax.random.normal(k_x1, (8, 100), dtype=jnp.float32)
    out = jax.block_until_ready(net_arch2_forward(x, padded))
    ref = reference_forward(x, params)
    assert out.shape == (8, 10)
    assert jnp.allclose(out, ref, atol=1e-5, rtol=1e-5)

    # Batch 13 (exercises the round-up-to-8 + slice-back path).
    x2 = jax.random.normal(k_x2, (13, 100), dtype=jnp.float32)
    out2 = jax.block_until_ready(net_arch2_forward(x2, padded))
    ref2 = reference_forward(x2, params)
    assert out2.shape == (13, 10)
    assert jnp.allclose(out2, ref2, atol=1e-5, rtol=1e-5)

    print("KERNEL_OK")
</pallas_src>

<mosaic_0001>
module attributes {stable_mosaic.version = 11 : i64} {
  func.func @mlp_kernel(%arg0: i32, %arg1: memref<8x100xf32, #tpu.memory_space<vmem>>, %arg2: memref<128x128xf32, #tpu.memory_space<vmem>>, %arg3: memref<1x128xf32, #tpu.memory_space<vmem>>, %arg4: memref<128x128xf32, #tpu.memory_space<vmem>>, %arg5: memref<1x128xf32, #tpu.memory_space<vmem>>, %arg6: memref<128x128xf32, #tpu.memory_space<vmem>>, %arg7: memref<1x128xf32, #tpu.memory_space<vmem>>, %arg8: memref<128x10xf32, #tpu.memory_space<vmem>>, %arg9: memref<1x10xf32, #tpu.memory_space<vmem>>, %arg10: memref<8x10xf32, #tpu.memory_space<vmem>>, %arg11: memref<8x128xf32, #tpu.memory_space<vmem>>) attributes {dimension_semantics = [#tpu.dimension_semantics<parallel>], iteration_bounds = array<i64: 1>, scalar_prefetch = 0 : i64, scratch_operands = 1 : i64, tpu.core_type = #tpu.core_type<tc>, window_params = [{transform_indices = @transform_0, window_bounds = array<i64: 8, 100>}, {pipeline_mode = #tpu.pipeline_mode<synchronous>, transform_indices = @transform_1, window_bounds = array<i64: 128, 128>}, {pipeline_mode = #tpu.pipeline_mode<synchronous>, transform_indices = @transform_2, window_bounds = array<i64: 1, 128>}, {pipeline_mode = #tpu.pipeline_mode<synchronous>, transform_indices = @transform_3, window_bounds = array<i64: 128, 128>}, {pipeline_mode = #tpu.pipeline_mode<synchronous>, transform_indices = @transform_4, window_bounds = array<i64: 1, 128>}, {pipeline_mode = #tpu.pipeline_mode<synchronous>, transform_indices = @transform_5, window_bounds = array<i64: 128, 128>}, {pipeline_mode = #tpu.pipeline_mode<synchronous>, transform_indices = @transform_6, window_bounds = array<i64: 1, 128>}, {pipeline_mode = #tpu.pipeline_mode<synchronous>, transform_indices = @transform_7, window_bounds = array<i64: 128, 10>}, {pipeline_mode = #tpu.pipeline_mode<synchronous>, transform_indices = @transform_8, window_bounds = array<i64: 1, 10>}, {transform_indices = @transform_9, window_bounds = array<i64: 8, 10>}]} {
    %c0 = arith.constant 0 : index
    %c0_0 = arith.constant 0 : index
    %0 = vector.load %arg1[%c0, %c0_0] : memref<8x100xf32, #tpu.memory_space<vmem>>, vector<8x100xf32>
    %c0_1 = arith.constant 0 : index
    %c0_2 = arith.constant 0 : index
    %1 = vector.load %arg11[%c0_1, %c0_2] : memref<8x128xf32, #tpu.memory_space<vmem>>, vector<8x100xf32>
    tpu.vector_store %arg11[%c0_1, %c0_2], %0 {strides = array<i32>} : memref<8x128xf32, #tpu.memory_space<vmem>>, vector<8x100xf32>,
    %cst = arith.constant 0.000000e+00 : f32
    %2 = vector.broadcast %cst : f32 to vector<8x28xf32>
    %c0_3 = arith.constant 0 : index
    %c100 = arith.constant 100 : index
    %3 = vector.load %arg11[%c0_3, %c100] : memref<8x128xf32, #tpu.memory_space<vmem>>, vector<8x28xf32>
    tpu.vector_store %arg11[%c0_3, %c100], %2 {strides = array<i32>} : memref<8x128xf32, #tpu.memory_space<vmem>>, vector<8x28xf32>,
    %c0_4 = arith.constant 0 : index
    %c0_5 = arith.constant 0 : index
    %4 = vector.load %arg11[%c0_4, %c0_5] : memref<8x128xf32, #tpu.memory_space<vmem>>, vector<8x128xf32>
    %c0_6 = arith.constant 0 : index
    %c0_7 = arith.constant 0 : index
    %5 = vector.load %arg2[%c0_6, %c0_7] : memref<128x128xf32, #tpu.memory_space<vmem>>, vector<128x128xf32>
    %cst_8 = arith.constant dense<0.000000e+00> : vector<8x128xf32>
    %6 = tpu.matmul %4, %5, %cst_8 {dimension_numbers = #tpu.dot_dimension_numbers<[1], [0], [0], [1], [0, 0, 1, 1], [], []>} : vector<8x128xf32>, vector<128x128xf32>, vector<8x128xf32> -> vector<8x128xf32>
    %c0_9 = arith.constant 0 : index
    %c0_10 = arith.constant 0 : index
    %7 = vector.load %arg3[%c0_9, %c0_10] : memref<1x128xf32, #tpu.memory_space<vmem>>, vector<1x128xf32>
    %8 = vector.broadcast %7 : vector<1x128xf32> to vector<8x128xf32>
    %9 = arith.addf %6, %8 : vector<8x128xf32>
    %cst_11 = arith.constant 0.000000e+00 : f32
    %10 = vector.broadcast %cst_11 : f32 to vector<8x128xf32>
    %11 = arith.maximumf %9, %10 : vector<8x128xf32>
    %c0_12 = arith.constant 0 : index
    %c0_13 = arith.constant 0 : index
    %12 = vector.load %arg4[%c0_12, %c0_13] : memref<128x128xf32, #tpu.memory_space<vmem>>, vector<128x128xf32>
    %cst_14 = arith.constant dense<0.000000e+00> : vector<8x128xf32>
    %13 = tpu.matmul %11, %12, %cst_14 {dimension_numbers = #tpu.dot_dimension_numbers<[1], [0], [0], [1], [0, 0, 1, 1], [], []>} : vector<8x128xf32>, vector<128x128xf32>, vector<8x128xf32> -> vector<8x128xf32>
    %c0_15 = arith.constant 0 : index
    %c0_16 = arith.constant 0 : index
    %14 = vector.load %arg5[%c0_15, %c0_16] : memref<1x128xf32, #tpu.memory_space<vmem>>, vector<1x128xf32>
    %15 = vector.broadcast %14 : vector<1x128xf32> to vector<8x128xf32>
    %16 = arith.addf %13, %15 : vector<8x128xf32>
    %cst_17 = arith.constant 0.000000e+00 : f32
    %17 = vector.broadcast %cst_17 : f32 to vector<8x128xf32>
    %18 = arith.maximumf %16, %17 : vector<8x128xf32>
    %c0_18 = arith.constant 0 : index
    %c0_19 = arith.constant 0 : index
    %19 = vector.load %arg6[%c0_18, %c0_19] : memref<128x128xf32, #tpu.memory_space<vmem>>, vector<128x128xf32>
    %cst_20 = arith.constant dense<0.000000e+00> : vector<8x128xf32>
    %20 = tpu.matmul %18, %19, %cst_20 {dimension_numbers = #tpu.dot_dimension_numbers<[1], [0], [0], [1], [0, 0, 1, 1], [], []>} : vector<8x128xf32>, vector<128x128xf32>, vector<8x128xf32> -> vector<8x128xf32>
    %c0_21 = arith.constant 0 : index
    %c0_22 = arith.constant 0 : index
    %21 = vector.load %arg7[%c0_21, %c0_22] : memref<1x128xf32, #tpu.memory_space<vmem>>, vector<1x128xf32>
    %22 = vector.broadcast %21 : vector<1x128xf32> to vector<8x128xf32>
    %23 = arith.addf %20, %22 : vector<8x128xf32>
    %cst_23 = arith.constant 0.000000e+00 : f32
    %24 = vector.broadcast %cst_23 : f32 to vector<8x128xf32>
    %25 = arith.maximumf %23, %24 : vector<8x128xf32>
    %c0_24 = arith.constant 0 : index
    %c0_25 = arith.constant 0 : index
    %26 = vector.load %arg8[%c0_24, %c0_25] : memref<128x10xf32, #tpu.memory_space<vmem>>, vector<128x10xf32>
    %cst_26 = arith.constant dense<0.000000e+00> : vector<8x10xf32>
    %27 = tpu.matmul %25, %26, %cst_26 {dimension_numbers = #tpu.dot_dimension_numbers<[1], [0], [0], [1], [0, 0, 1, 1], [], []>} : vector<8x128xf32>, vector<128x10xf32>, vector<8x10xf32> -> vector<8x10xf32>
    %c0_27 = arith.constant 0 : index
    %c0_28 = arith.constant 0 : index
    %28 = vector.load %arg9[%c0_27, %c0_28] : memref<1x10xf32, #tpu.memory_space<vmem>>, vector<1x10xf32>
    %29 = vector.broadcast %28 : vector<1x10xf32> to vector<8x10xf32>
    %30 = arith.addf %27, %29 : vector<8x10xf32>
    %cst_29 = arith.constant dense<0xFF800000> : vector<8xf32>
    %31 = vector.multi_reduction <maximumf>, %30, %cst_29 [1] : vector<8x10xf32> to vector<8xf32>
    %32 = vector.shape_cast %31 : vector<8xf32> to vector<8x1xf32>
    %33 = vector.broadcast %32 : vector<8x1xf32> to vector<8x10xf32>
    %34 = arith.subf %30, %33 : vector<8x10xf32>
    %35 = math.exp %34 : vector<8x10xf32>
    %cst_30 = arith.constant dense<0.000000e+00> : vector<8xf32>
    %36 = vector.multi_reduction <add>, %35, %cst_30 [1] : vector<8x10xf32> to vector<8xf32>
    %37 = vector.shape_cast %36 : vector<8xf32> to vector<8x1xf32>
    %38 = math.log %37 : vector<8x1xf32>
    %39 = vector.broadcast %38 : vector<8x1xf32> to vector<8x10xf32>
    %40 = arith.subf %34, %39 : vector<8x10xf32>
    %c0_31 = arith.constant 0 : index
    %c0_32 = arith.constant 0 : index
    %41 = vector.load %arg10[%c0_31, %c0_32] : memref<8x10xf32, #tpu.memory_space<vmem>>, vector<8x10xf32>
    tpu.vector_store %arg10[%c0_31, %c0_32], %40 {strides = array<i32>} : memref<8x10xf32, #tpu.memory_space<vmem>>, vector<8x10xf32>,
    return
  }
  func.func @transform_0(%arg0: i32) -> (i32, i32) {
    %c0_i32 = arith.constant 0 : i32
    %c0_i32_0 = arith.constant 0 : i32
    return %arg0, %c0_i32 : i32, i32
  }
  func.func @transform_1(%arg0: i32) -> (i32, i32) {
    %c0_i32 = arith.constant 0 : i32
    %c0_i32_0 = arith.constant 0 : i32
    %c0_i32_1 = arith.constant 0 : i32
    return %c0_i32, %c0_i32_0 : i32, i32
  }
  func.func @transform_2(%arg0: i32) -> (i32, i32) {
    %c0_i32 = arith.constant 0 : i32
    %c0_i32_0 = arith.constant 0 : i32
    %c0_i32_1 = arith.constant 0 : i32
    return %c0_i32, %c0_i32_0 : i32, i32
  }
  func.func @transform_3(%arg0: i32) -> (i32, i32) {
    %c0_i32 = arith.constant 0 : i32
    %c0_i32_0 = arith.constant 0 : i32
    %c0_i32_1 = arith.constant 0 : i32
    return %c0_i32, %c0_i32_0 : i32, i32
  }
  func.func @transform_4(%arg0: i32) -> (i32, i32) {
    %c0_i32 = arith.constant 0 : i32
    %c0_i32_0 = arith.constant 0 : i32
    %c0_i32_1 = arith.constant 0 : i32
    return %c0_i32, %c0_i32_0 : i32, i32
  }
  func.func @transform_5(%arg0: i32) -> (i32, i32) {
    %c0_i32 = arith.constant 0 : i32
    %c0_i32_0 = arith.constant 0 : i32
    %c0_i32_1 = arith.constant 0 : i32
    return %c0_i32, %c0_i32_0 : i32, i32
  }
  func.func @transform_6(%arg0: i32) -> (i32, i32) {
    %c0_i32 = arith.constant 0 : i32
    %c0_i32_0 = arith.constant 0 : i32
    %c0_i32_1 = arith.constant 0 : i32
    return %c0_i32, %c0_i32_0 : i32, i32
  }
  func.func @transform_7(%arg0: i32) -> (i32, i32) {
    %c0_i32 = arith.constant 0 : i32
    %c0_i32_0 = arith.constant 0 : i32
    %c0_i32_1 = arith.constant 0 : i32
    return %c0_i32, %c0_i32_0 : i32, i32
  }
  func.func @transform_8(%arg0: i32) -> (i32, i32) {
    %c0_i32 = arith.constant 0 : i32
    %c0_i32_0 = arith.constant 0 : i32
    %c0_i32_1 = arith.constant 0 : i32
    return %c0_i32, %c0_i32_0 : i32, i32
  }
  func.func @transform_9(%arg0: i32) -> (i32, i32) {
    %c0_i32 = arith.constant 0 : i32
    %c0_i32_0 = arith.constant 0 : i32
    return %arg0, %c0_i32 : i32, i32
  }
}

</mosaic_0001>

<bundles_post_ra>
// kernel: tpu_custom_call.1
= control target key start
LH: loop header
LB: loop body
LE: loop exit
PB: predicated region body
PF: predicated region fallthrough
CT: control target
= control target key end

     0   :  { %14 = vsyncpa [#allocation4], 0  ;;  %s1113_s0 = inlined_call_operand.vmem [shape: f32[8,100], index: 0, kind: input, shape index: {}]   ;;  %s1114_s1 = inlined_call_operand.vmem [shape: f32[128,128], index: 1, kind: input, shape index: {}]   ;;  %s1115_s2 = inlined_call_operand.vmem [shape: f32[1,128], index: 2, kind: input, shape index: {}]   ;;  %s1116_s3 = inlined_call_operand.hbm [shape: f32[128,128], index: 3, kind: input, shape index: {}]   ;;  %s1117_s4 = inlined_call_operand.vmem [shape: f32[1,128], index: 4, kind: input, shape index: {}]   ;;  %s1118_s5 = inlined_call_operand.hbm [shape: f32[128,128], index: 5, kind: input, shape index: {}]   ;;  %s1119_s6 = inlined_call_operand.vmem [shape: f32[1,128], index: 6, kind: input, shape index: {}]   ;;  %s1120_s7 = inlined_call_operand.vmem [shape: f32[128,10], index: 7, kind: input, shape index: {}]   ;;  %s1121_s8 = inlined_call_operand.vmem [shape: f32[1,10], index: 8, kind: input, shape index: {}]   ;;  %s1122_s9 = inlined_call_operand.hbm [shape: f32[8,10], index: 9, kind: output, shape index: {}]  }
   0x1   :  { %15 = vsyncpa [#allocation7], 0 }
   0x2   :  { %16 = vsyncpa [#allocation5], 0  ;;  %s864_s30 = smov [#allocation3]   ;;  %s792_s13 = scalar_lea.hbm %s1116_s3, 2048 }
   0x3   :  { %s28_s10 = sshll.u32 %s864_s30, 4  ;;  %p793_p0 = scmp.ne.s32.totalorder %s1116_s3, %s792_s13  ;;  %s29_s10 = int_to_ptr.vmem [resolvable:$true] %s28_s10 }
   0x4   :  { %p796_p1 = scmp.lt.u32.totalorder %s792_s13, %s1116_s3 }
   0x6   :  { %p798_p2 = pnand %p796_p1, %p793_p0 }
   0x8   :  { %801 = shalt.err (!%p798_p2)
}
   0x9   :  { %s802_s18 = scalar_lea.vmem %s29_s10, 2048  ;;  %p807_p4 = scmp.lt.s32.totalorder %s29_s10, %s29_s10 }
   0xa   :  { %p803_p3 = scmp.ne.s32.totalorder %s29_s10, %s802_s18  ;;  %p808_p5 = scmp.lt.s32.totalorder %s802_s18, %s802_s18 }
   0xc   :  { %p809_p6 = por %p808_p5, %p807_p4 }
   0xe   :  { %p810_p7 = pnand %p809_p6, %p803_p3 }
  0x10   :  { %813 = shalt.err (!%p810_p7)
}
  0x11   :  { %s865_s19 = smov 128   ;;  %s866_s20 = smov 8  }
  0x12   :  { %34 = dma.hbm_to_vmem [thread:$0]  %s1116_s3, 2048, %s29_s10, [#allocation4], %s865_s19, %s865_s19, %s866_s20  }
  0x13   :  { %s867_s23 = smov [#allocation6]   ;;  %s814_s27 = scalar_lea.hbm %s1118_s5, 2048 }
  0x14   :  { %s42_s24 = sshll.u32 %s867_s23, 4  ;;  %p815_p8 = scmp.ne.s32.totalorder %s1118_s5, %s814_s27  ;;  %s43_s24 = int_to_ptr.vmem [resolvable:$true] %s42_s24 }
  0x15   :  { %p818_p9 = scmp.lt.u32.totalorder %s814_s27, %s1118_s5 }
  0x17   :  { %p820_p10 = pnand %p818_p9, %p815_p8 }
  0x19   :  { %823 = shalt.err (!%p820_p10)
}
  0x1a   :  { %s824_s12 = scalar_lea.vmem %s43_s24, 2048  ;;  %p829_p12 = scmp.lt.s32.totalorder %s43_s24, %s43_s24 }
  0x1b   :  { %p825_p11 = scmp.ne.s32.totalorder %s43_s24, %s824_s12  ;;  %p830_p13 = scmp.lt.s32.totalorder %s824_s12, %s824_s12 }
  0x1d   :  { %p831_p0 = por %p830_p13, %p829_p12 }
  0x1f   :  { %p832_p1 = pnand %p831_p0, %p825_p11 }
  0x21   :  { %835 = shalt.err (!%p832_p1)
}
  0x22   :  { %48 = dma.hbm_to_vmem [thread:$0]  %s1118_s5, 2048, %s43_s24, [#allocation7], %s865_s19, %s865_s19, %s866_s20  }
  0x23   :  { %858 = dma.done.wait [#allocation4], 2048  }
  0x24   :  { %859 = vsyncadd [#allocation4], 4294965248 }
  0x25   :  { %860 = dma.done.wait [#allocation7], 2048  }
  0x26   :  { %861 = vsyncadd [#allocation7], 4294965248  ;;  %v868_v0 = vmov 0.0|0.0   ;;  %vm869_vm0 = vmmov 0   ;;  %v870_v1 = vmov 0.0   ;;  %v67_v2 = vld [vmem:[%s1114_s1] sm:$0xff] }
  0x27   :  { %684 = vmatprep.subr.bf16.mxu0 %v868_v0  ;;  %708 = vmatprep.subr.bf16.mxu1 %v868_v0  ;;  %v68_v3 = vld [vmem:[%s1114_s1 + $0x8] sm:$0xff]  ;;  %v69_v4 = vld [vmem:[%s1114_s1 + $0x10] sm:$0xff]  ;;  %v70_v6 = vld [vmem:[%s1114_s1 + $0x18] sm:$0xff]  ;;  %vm62_vm1 = vcmask 818176   ;;  %vm64_vm2 = vcmask 1048352   ;;  %vm442_vm3 = vcmask 80896  }
  0x28   :  { %576 = vmatprep.mubr.msk.f32.mxu0 %vm869_vm0, %v870_v1  ;;  %611 = vmatprep.mubr.msk.f32.mxu1 %vm869_vm0, %v870_v1  ;;  %v685_v5 = vpack.c.bf16 %v68_v3, %v67_v2  ;;  %v688_v7 = vpack.c.bf16 %v70_v6, %v69_v4  ;;  %v71_v8 = vld [vmem:[%s1114_s1 + $0x20] sm:$0xff]  ;;  %v72_v9 = vld [vmem:[%s1114_s1 + $0x28] sm:$0xff]  ;;  %v162_v12 = vld [vmem:[#allocation3 + $0x8] sm:$0xff] }
  0x29   :  { %v61_v10 = vld [vmem:[%s1113_s0] sm:$0xff]  ;;  %v161_v11 = vld [vmem:[#allocation3] sm:$0xff]  ;;  %v163_v13 = vld [vmem:[#allocation3 + $0x10] sm:$0xff]  ;;  %v691_v15 = vpack.c.bf16 %v72_v9, %v71_v8 }
  0x2a   :  { %686 = vmatpush3.bf16.msra.mxu0 %v685_v5  ;;  %63 = vst.msk [vmem:[#allocation2] sm:$0xff] %vm62_vm1, %v61_v10  ;;  %v164_v14 = vld [vmem:[#allocation3 + $0x18] sm:$0xff]  ;;  %v709_v16 = vpack.c.bf16 %v162_v12, %v161_v11  ;;  %v73_v17 = vld [vmem:[%s1114_s1 + $0x30] sm:$0xff]  ;;  %v74_v18 = vld [vmem:[%s1114_s1 + $0x38] sm:$0xff] }
  0x2b   :  { %687 = vmatprep.subr.bf16.mxu0 %v868_v0  ;;  %65 = vst.msk [vmem:[#allocation2] sm:$0xff] %vm64_vm2, %v870_v1  ;;  %v712_v19 = vpack.c.bf16 %v164_v14, %v163_v13  ;;  %v165_v20 = vld [vmem:[#allocation3 + $0x20] sm:$0xff]  ;;  %v166_v21 = vld [vmem:[#allocation3 + $0x28] sm:$0xff]  ;;  %v694_v22 = vpack.c.bf16 %v74_v18, %v73_v17  ;;  %v75_v23 = vld [vmem:[%s1114_s1 + $0x40] sm:$0xff] }
  0x2c   :  { %710 = vmatpush3.bf16.msra.mxu1 %v709_v16  ;;  %v76_v24 = vld [vmem:[%s1114_s1 + $0x48] sm:$0xff]  ;;  %v715_v25 = vpack.c.bf16 %v166_v21, %v165_v20  ;;  %v167_v26 = vld [vmem:[#allocation3 + $0x30] sm:$0xff]  ;;  %v168_v27 = vld [vmem:[#allocation3 + $0x38] sm:$0xff] }
  0x2d   :  { %711 = vmatprep.subr.bf16.mxu1 %v868_v0  ;;  %v697_v28 = vpack.c.bf16 %v76_v24, %v75_v23  ;;  %v77_v29 = vld [vmem:[%s1114_s1 + $0x50] sm:$0xff]  ;;  %v78_v30 = vld [vmem:[%s1114_s1 + $0x58] sm:$0xff]  ;;  %v718_v31 = vpack.c.bf16 %v168_v27, %v167_v26  ;;  %v169_v32 = vld [vmem:[#allocation3 + $0x40] sm:$0xff] }
  0x2e   :  { %689 = vmatpush3.bf16.msra.mxu0 %v688_v7  ;;  %v170_v33 = vld [vmem:[#allocation3 + $0x48] sm:$0xff]  ;;  %v700_v34 = vpack.c.bf16 %v78_v30, %v77_v29  ;;  %v79_v35 = vld [vmem:[%s1114_s1 + $0x60] sm:$0xff]  ;;  %v80_v36 = vld [vmem:[%s1114_s1 + $0x68] sm:$0xff] }
  0x2f   :  { %690 = vmatprep.subr.bf16.mxu0 %v868_v0  ;;  %v721_v37 = vpack.c.bf16 %v170_v33, %v169_v32  ;;  %v171_v38 = vld [vmem:[#allocation3 + $0x50] sm:$0xff]  ;;  %v172_v39 = vld [vmem:[#allocation3 + $0x58] sm:$0xff]  ;;  %v703_v40 = vpack.c.bf16 %v80_v36, %v79_v35  ;;  %v81_v41 = vld [vmem:[%s1114_s1 + $0x70] sm:$0xff] }
  0x30   :  { %713 = vmatpush3.bf16.msra.mxu1 %v712_v19  ;;  %v82_v42 = vld [vmem:[%s1114_s1 + $0x78] sm:$0xff]  ;;  %v724_v43 = vpack.c.bf16 %v172_v39, %v171_v38  ;;  %v173_v44 = vld [vmem:[#allocation3 + $0x60] sm:$0xff]  ;;  %v174_v45 = vld [vmem:[#allocation3 + $0x68] sm:$0xff] }
  0x31   :  { %714 = vmatprep.subr.bf16.mxu1 %v868_v0  ;;  %v706_v46 = vpack.c.bf16 %v82_v42, %v81_v41  ;;  %v727_v47 = vpack.c.bf16 %v174_v45, %v173_v44  ;;  %v175_v49 = vld [vmem:[#allocation3 + $0x70] sm:$0xff]  ;;  %v176_v50 = vld [vmem:[#allocation3 + $0x78] sm:$0xff]  ;;  %v255_v52 = vld [vmem:[#allocation6] sm:$0xff] }
  0x32   :  { %692 = vmatpush3.bf16.msra.mxu0 %v691_v15  ;;  %v66_v48 = vld [vmem:[#allocation2] sm:$0xff]  ;;  %v730_v51 = vpack.c.bf16 %v176_v50, %v175_v49  ;;  %v256_v53 = vld [vmem:[#allocation6 + $0x8] sm:$0xff]  ;;  %v257_v54 = vld [vmem:[#allocation6 + $0x10] sm:$0xff] }
  0x33   :  { %693 = vmatprep.subr.bf16.mxu0 %v868_v0  ;;  %v733_v55 = vpack.c.bf16 %v256_v53, %v255_v52  ;;  %v258_v56 = vld [vmem:[#allocation6 + $0x18] sm:$0xff]  ;;  %v259_v58 = vld [vmem:[#allocation6 + $0x20] sm:$0xff]  ;;  %v260_v59 = vld [vmem:[#allocation6 + $0x28] sm:$0xff] }
  0x34   :  { %716 = vmatpush3.bf16.msra.mxu1 %v715_v25  ;;  %v736_v57 = vpack.c.bf16 %v258_v56, %v257_v54  ;;  %v739_v60 = vpack.c.bf16 %v260_v59, %v259_v58  ;;  %v261_v61 = vld [vmem:[#allocation6 + $0x30] sm:$0xff]  ;;  %v262_v62 = vld [vmem:[#allocation6 + $0x38] sm:$0xff]  ;;  %v263_v2 = vld [vmem:[#allocation6 + $0x40] sm:$0xff] }
  0x35   :  { %717 = vmatprep.subr.bf16.mxu1 %v868_v0  ;;  %v742_v63 = vpack.c.bf16 %v262_v62, %v261_v61  ;;  %v264_v3 = vld [vmem:[#allocation6 + $0x48] sm:$0xff]  ;;  %v265_v5 = vld [vmem:[#allocation6 + $0x50] sm:$0xff]  ;;  %v266_v6 = vld [vmem:[#allocation6 + $0x58] sm:$0xff] }
  0x36   :  { %695 = vmatpush3.bf16.msra.mxu0 %v694_v22  ;;  %v745_v4 = vpack.c.bf16 %v264_v3, %v263_v2  ;;  %v748_v7 = vpack.c.bf16 %v266_v6, %v265_v5  ;;  %v267_v8 = vld [vmem:[#allocation6 + $0x60] sm:$0xff]  ;;  %v268_v9 = vld [vmem:[#allocation6 + $0x68] sm:$0xff]  ;;  %v472_v11 = vld [vmem:[%s1115_s2] ss:$0 sm:$0xff] }
  0x37   :  { %696 = vmatprep.subr.bf16.mxu0 %v868_v0  ;;  %v751_v10 = vpack.c.bf16 %v268_v9, %v267_v8  ;;  %v269_v16 = vld [vmem:[#allocation6 + $0x70] sm:$0xff]  ;;  %v270_v17 = vld [vmem:[#allocation6 + $0x78] sm:$0xff]  ;;  %v350_v20 = vld [vmem:[%s1120_s7 + $0x8] sm:$0xff] }
  0x38   :  { %719 = vmatpush3.bf16.msra.mxu1 %v718_v31  ;;  %v754_v18 = vpack.c.bf16 %v270_v17, %v269_v16  ;;  %v349_v19 = vld [vmem:[%s1120_s7] sm:$0xff]  ;;  %v351_v21 = vld [vmem:[%s1120_s7 + $0x10] sm:$0xff]  ;;  %v354_v25 = vld [vmem:[%s1120_s7 + $0x28] sm:$0xff] }
  0x39   :  { %720 = vmatprep.subr.bf16.mxu1 %v868_v0  ;;  %v757_v22 = vpack.c.bf16 %v350_v20, %v349_v19  ;;  %v353_v24 = vld [vmem:[%s1120_s7 + $0x20] sm:$0xff]  ;;  %v355_v27 = vld [vmem:[%s1120_s7 + $0x30] sm:$0xff]  ;;  %v358_v31 = vld [vmem:[%s1120_s7 + $0x48] sm:$0xff] }
  0x3a   :  { %698 = vmatpush3.bf16.msra.mxu0 %v697_v28  ;;  %v763_v26 = vpack.c.bf16 %v354_v25, %v353_v24  ;;  %v356_v28 = vld [vmem:[%s1120_s7 + $0x38] sm:$0xff]  ;;  %v357_v30 = vld [vmem:[%s1120_s7 + $0x40] sm:$0xff]  ;;  %v359_v33 = vld [vmem:[%s1120_s7 + $0x50] sm:$0xff] }
  0x3b   :  { %699 = vmatprep.subr.bf16.mxu0 %v868_v0  ;;  %v766_v29 = vpack.c.bf16 %v356_v28, %v355_v27  ;;  %v769_v32 = vpack.c.bf16 %v358_v31, %v357_v30  ;;  %v361_v36 = vld [vmem:[%s1120_s7 + $0x60] sm:$0xff]  ;;  %v363_v44 = vld [vmem:[%s1120_s7 + $0x70] sm:$0xff]  ;;  %v364_v45 = vld [vmem:[%s1120_s7 + $0x78] sm:$0xff] }
  0x3c   :  { %722 = vmatpush3.bf16.msra.mxu1 %v721_v37  ;;  %v362_v37 = vld [vmem:[%s1120_s7 + $0x68] sm:$0xff]  ;;  %v473_v39 = vld [vmem:[%s1117_s4] ss:$0 sm:$0xff] }
  0x3d   :  { %723 = vmatprep.subr.bf16.mxu1 %v868_v0  ;;  %v775_v38 = vpack.c.bf16 %v362_v37, %v361_v36 }
  0x3e   :  { %701 = vmatpush3.bf16.msra.mxu0 %v700_v34  ;;  %v360_v34 = vld [vmem:[%s1120_s7 + $0x58] sm:$0xff] }
  0x3f   :  { %702 = vmatprep.subr.bf16.mxu0 %v868_v0  ;;  %v772_v35 = vpack.c.bf16 %v360_v34, %v359_v33 }
  0x40   :  { %725 = vmatpush3.bf16.msra.mxu1 %v724_v43 }
  0x41   :  { %726 = vmatprep.subr.bf16.mxu1 %v868_v0 }
  0x42   :  { %704 = vmatpush3.bf16.msra.mxu0 %v703_v40 }
  0x43   :  { %705 = vmatprep.subr.bf16.mxu0 %v868_v0 }
  0x44   :  { %728 = vmatpush3.bf16.msra.mxu1 %v727_v47 }
  0x45   :  { %729 = vmatprep.subr.bf16.mxu1 %v868_v0 }
  0x46   :  { %707 = vmatpush3.bf16.msra.mxu0 %v706_v46  ;;  %v778_v46 = vpack.c.bf16 %v364_v45, %v363_v44 }
  0x47   :  { %732 = vmatprep.subr.bf16.mxu0 %v868_v0 }
  0x48   :  { %731 = vmatpush3.bf16.msra.mxu1 %v730_v51  ;;  %v475_v51 = vld [vmem:[%s1121_s8] ss:$0 sm:$0xff] }
  0x49   :  { %577 = vmatmul.mubr.f32.vlgmr.msra.gmra.mrb[0].mxu0 %v66_v48  ;;  %756 = vmatprep.subr.bf16.mxu1 %v868_v0 }
  0x4a   :  { %646 = vmatprep.mubr.msk.f32.mxu0 %vm869_vm0, %v870_v1  ;;  %734 = vmatpush3.bf16.msra.mxu0 %v733_v55 }
  0x4b   :  { %735 = vmatprep.subr.bf16.mxu0 %v868_v0 }
  0x4e   :  { %737 = vmatpush3.bf16.msra.mxu0 %v736_v57 }
  0x4f   :  { %738 = vmatprep.subr.bf16.mxu0 %v868_v0 }
  0x52   :  { %740 = vmatpush3.bf16.msra.mxu0 %v739_v60 }
  0x53   :  { %741 = vmatprep.subr.bf16.mxu0 %v868_v0 }
  0x56   :  { %743 = vmatpush3.bf16.msra.mxu0 %v742_v63 }
  0x57   :  { %744 = vmatprep.subr.bf16.mxu0 %v868_v0 }
  0x5a   :  { %746 = vmatpush3.bf16.msra.mxu0 %v745_v4 }
  0x5b   :  { %747 = vmatprep.subr.bf16.mxu0 %v868_v0 }
  0x5e   :  { %749 = vmatpush3.bf16.msra.mxu0 %v748_v7 }
  0x5f   :  { %750 = vmatprep.subr.bf16.mxu0 %v868_v0 }
  0x62   :  { %752 = vmatpush3.bf16.msra.mxu0 %v751_v10 }
  0x63   :  { %753 = vmatprep.subr.bf16.mxu0 %v868_v0 }
  0x66   :  { %755 = vmatpush3.bf16.msra.mxu0 %v754_v18 }
 0x11c   :  { %v156_v12 = vpop.f32.mrb[0].mxu0 }
 0x11d   :  { %v157_v13 = vadd.f32 %v472_v11, %v156_v12  ;;  %v578_v14 = vpop.f32.mrb[1].mxu0 }
 0x11f   :  { %v160_v15 = vmax.f32 %v157_v13, 0.0 }
 0x121   :  { %612 = vmatmul.mubr.f32.vlgmr.msra.gmra.mrb[0].mxu1 %v160_v15 }
 0x122   :  { %681 = vmatprep.mubr.msk.f32.mxu1 %vm869_vm0, %v870_v1  ;;  %v352_v1 = vld [vmem:[%s1120_s7 + $0x18] sm:$0xff]  ;;  %758 = vmatpush3.bf16.msra.mxu1 %v757_v22 }
 0x123   :  { %v760_v23 = vpack.c.bf16 %v352_v1, %v351_v21  ;;  %759 = vmatprep.subr.bf16.mxu1 %v868_v0 }
 0x126   :  { %761 = vmatpush3.bf16.msra.mxu1 %v760_v23 }
 0x127   :  { %762 = vmatprep.subr.bf16.mxu1 %v868_v0 }
 0x12a   :  { %764 = vmatpush3.bf16.msra.mxu1 %v763_v26 }
 0x12b   :  { %765 = vmatprep.subr.bf16.mxu1 %v868_v0 }
 0x12e   :  { %767 = vmatpush3.bf16.msra.mxu1 %v766_v29 }
 0x12f   :  { %768 = vmatprep.subr.bf16.mxu1 %v868_v0 }
 0x132   :  { %770 = vmatpush3.bf16.msra.mxu1 %v769_v32 }
 0x133   :  { %771 = vmatprep.subr.bf16.mxu1 %v868_v0 }
 0x136   :  { %773 = vmatpush3.bf16.msra.mxu1 %v772_v35 }
 0x137   :  { %774 = vmatprep.subr.bf16.mxu1 %v868_v0 }
 0x13a   :  { %776 = vmatpush3.bf16.msra.mxu1 %v775_v38 }
 0x13b   :  { %777 = vmatprep.subr.bf16.mxu1 %v868_v0  ;;  %v474_v0 = vld [vmem:[%s1119_s6] ss:$0 sm:$0xff]  ;;  %s871_s6 = smov [#allocation8]  }
 0x13c   :  { %s462_s7 = sshll.u32 %s871_s6, 4  ;;  %s463_s7 = int_to_ptr.vmem [resolvable:$true] %s462_s7 }
 0x13d   :  { %s836_s8 = scalar_lea.vmem %s463_s7, 128  ;;  %p841_p3 = scmp.lt.s32.totalorder %s463_s7, %s463_s7 }
 0x13e   :  { %779 = vmatpush3.bf16.msra.mxu1 %v778_v46  ;;  %p837_p2 = scmp.ne.s32.totalorder %s463_s7, %s836_s8  ;;  %p842_p4 = scmp.lt.s32.totalorder %s836_s8, %s836_s8 }
 0x140   :  { %p843_p5 = por %p842_p4, %p841_p3 }
 0x142   :  { %p844_p6 = pnand %p843_p5, %p837_p2 }
 0x1f4   :  { %v250_v40 = vpop.f32.mrb[0].mxu1 }
 0x1f5   :  { %v251_v41 = vadd.f32 %v473_v39, %v250_v40  ;;  %v613_v42 = vpop.f32.mrb[1].mxu1 }
 0x1f7   :  { %v254_v43 = vmax.f32 %v251_v41, 0.0 }
 0x1f9   :  { %647 = vmatmul.mubr.f32.vlgmr.msra.gmra.mrb[2].mxu0 %v254_v43 }
 0x2cc   :  { %v344_v47 = vpop.f32.mrb[2].mxu0 }
 0x2cd   :  { %v345_v48 = vadd.f32 %v474_v0, %v344_v47  ;;  %v648_v49 = vpop.f32.mrb[3].mxu0 }
 0x2cf   :  { %v348_v50 = vmax.f32 %v345_v48, 0.0 }
 0x2d1   :  { %682 = vmatmul.mubr.f32.vlgmr.msra.gmra.mrb[2].mxu1 %v348_v50 }
 0x3a4   :  { %v438_v52 = vpop.f32.mrb[2].mxu1 }
 0x3a5   :  { %v439_v53 = vadd.f32 %v475_v51, %v438_v52  ;;  %v683_v54 = vpop.f32.mrb[3].mxu1 }
 0x3a7   :  { %v443_v55 = vsel %vm442_vm3, %v439_v53, -inf }
 0x3a8   :  { %444 = vmax.xlane.f32.xlu0 %v443_v55 }
 0x435   :  { %v445_v56 = vpop.xlane.xlu0 %444 }
 0x436   :  { %v446_v57 = vsub.f32 %v439_v53, %v445_v56 }
 0x438   :  { %v447_v58 = vmul.f32 1.442695, %v446_v57 }
 0x43a   :  { %788 = vpow2.f32 %v447_v58 }
 0x444   :  { %v789_v59 = vpop.eup %788 }
 0x445   :  { %v449_v60 = vsel %vm442_vm3, %v789_v59, 0.0 }
 0x446   :  { %450 = vadd.xlane.f32.xlu0 %v449_v60 }
 0x4d3   :  { %v451_v61 = vpop.xlane.xlu0 %450 }
 0x4d4   :  { %790 = vlog2.f32 %v451_v61 }
 0x4de   :  { %v791_v62 = vpop.eup %790 }
 0x4df   :  { %v453_v63 = vmul.f32 0.6931472, %v791_v62 }
 0x4e1   :  { %v454_v2 = vsub.f32 %v446_v57, %v453_v63 }
 0x4e3   :  { %455 = vst.msk [vmem:[#allocation8] sm:$0xff] %vm442_vm3, %v454_v2 }
 0x4e4   :  { %847 = shalt.err (!%p844_p6)
}
 0x4e5   :  { %s848_s10 = scalar_lea.hbm %s1122_s9, 128 }
 0x4e6   :  { %p849_p7 = scmp.ne.s32.totalorder %s1122_s9, %s848_s10  ;;  %p852_p8 = scmp.lt.u32.totalorder %s848_s10, %s1122_s9 }
 0x4e8   :  { %p854_p9 = pnand %p852_p8, %p849_p7 }
 0x4ea   :  { %857 = shalt.err (!%p854_p9)
}
 0x4eb   :  { %465 = dma.vmem_to_hbm [thread:$0]  %s463_s7, 128, %s1122_s9, [#allocation5]  }
 0x4ec   :  { %862 = dma.done.wait [#allocation5], 128  }
 0x4ed   :  { %863 = vsyncadd [#allocation5], 4294967168 }
 0x4ee   :  { %469 = vsyncpa [#allocation4], 1 }
 0x4ef   :  { %470 = vsyncpa [#allocation7], 1 }
 0x4f0   :  { %471 = vsyncpa [#allocation5], 1 }

</bundles_post_ra>
